<compile_context>
chip_gen: v5e
topology: v5e:2x2
jax: 0.10.0
libtpu: 0.0.40
codegen_flags: <defaults>
</compile_context>

<pallas_src>
import functools

import jax
import jax.numpy as jnp
from jax.experimental import pallas as pl
from jax.experimental.pallas import tpu as pltpu


def _stats_kernel(x_ref, sums_ref, *, tile_m, lanes, t_inner, m_valid,
                  full_cover):
    """Accumulate per-lane partial sums / sums-of-squares.

    Output block is (1, 16, lanes): rows 0:8 hold the 8 sublane partials of
    sum(x), rows 8:16 the sublane partials of sum(x*x).  The cross-sublane
    collapse happens once on the host, so the hot loop is pure vld + VPU adds.
    """
    t = pl.program_id(1)

    @pl.when(t == 0)
    def _():
        sums_ref[...] = jnp.zeros_like(sums_ref)

    x = x_ref[...].astype(jnp.float32)

    if not full_cover:
        # Zero-mask rows past the logical end (ragged last tile and/or
        # clamped duplicate blocks): their block contents are unspecified.
        block = pl.program_id(0) * t_inner + t
        rows = (jax.lax.broadcasted_iota(jnp.int32, (tile_m, 1), 0)
                + block * tile_m)
        x = jnp.where(rows < m_valid, x, 0.0)

    if tile_m % 8 == 0:
        xr = x.reshape(tile_m // 8, 8, lanes)
        sums_ref[0, 0:8, :] += jnp.sum(xr, axis=0)
        sums_ref[0, 8:16, :] += jnp.sum(xr * xr, axis=0)
    else:  # tiny-input fallback: fewer rows than one sublane group
        sums_ref[0, 0:1, :] += jnp.sum(x, axis=0, keepdims=True)
        sums_ref[0, 8:9, :] += jnp.sum(x * x, axis=0, keepdims=True)


def _normalize_kernel(x_ref, ss_ref, o_ref):
    """y = x * scale + shift; scale = ss[0], shift = ss[1], broadcast over rows."""
    x = x_ref[...].astype(jnp.float32)
    o_ref[...] = (x * ss_ref[0:1, :] + ss_ref[1:2, :]).astype(o_ref.dtype)


@functools.partial(jax.jit, static_argnames=("eps", "tile_m"))
def batch_norm_edge(e, gamma, beta, *, eps=1e-5, tile_m=1024):
    """Pallas implementation of BatchNormEdge.forward.

    Args:
      e:     (B, N, N, C, H) edge features.
      gamma: (H,) batch-norm weight.
      beta:  (H,) batch-norm bias.
    Returns:
      (B, N, N, C, H) normalized edge features, same dtype as e.
    """
    B, N1, N2, C, H = e.shape
    M = B * N1 * N2 * C

    # Lane-dense view: fold P consecutive rows into the 128-lane axis so each
    # vreg is fully used (H=32 alone fills only a quarter of a vreg).
    if H < 128 and 128 % H == 0 and M % (128 // H) == 0:
        P = 128 // H
    else:
        P = 1
    L = P * H
    M_lanes = M // P
    x = e.reshape(M_lanes, L)            # pure view: no copy, no pad

    # Row tile: multiple of 8 sublanes, never larger than the array itself.
    if M_lanes >= 8:
        tile = min(tile_m, (M_lanes // 8) * 8)
    else:
        tile = M_lanes
    grid_m = pl.cdiv(M_lanes, tile)

    # Leading "parallel" split of the reduction so v7x's two TensorCores each
    # stream half of the rows; pure loop split on single-TC chips.
    S = 2 if grid_m >= 2 else 1
    T = pl.cdiv(grid_m, S)
    full_cover = (S * T * tile == M_lanes)

    if S * T == grid_m:
        in_index = lambda s, t: (s * T + t, 0)
    else:
        in_index = lambda s, t: (jnp.minimum(s * T + t, grid_m - 1), 0)

    stats_kernel = functools.partial(
        _stats_kernel, tile_m=tile, lanes=L, t_inner=T, m_valid=M_lanes,
        full_cover=full_cover)

    # ---- Pass 1: per-lane partial sum / sum-of-squares (HBM-bound). ----
    partials = pl.pallas_call(
        stats_kernel,
        out_shape=jax.ShapeDtypeStruct((S, 16, L), jnp.float32),
        grid_spec=pltpu.PrefetchScalarGridSpec(
            num_scalar_prefetch=0,
            grid=(S, T),
            in_specs=[pl.BlockSpec((tile, L), in_index)],
            out_specs=pl.BlockSpec((1, 16, L), lambda s, t: (s, 0, 0)),
        ),
        compiler_params=pltpu.CompilerParams(
            dimension_semantics=("parallel", "arbitrary")),
    )(x)

    # Tiny host-side combine: collapse core partials + sublane partials, then
    # fold the P lane groups back onto the H hidden features.
    tot = partials.sum(axis=0)                                  # (16, L)
    sum_x = tot[0:8].sum(axis=0).reshape(P, H).sum(axis=0)      # (H,)
    sum_x2 = tot[8:16].sum(axis=0).reshape(P, H).sum(axis=0)    # (H,)

    mean = sum_x / M
    # NOTE: E[x^2]-E[x]^2 in f32; adequate for well-scaled activations. A
    # Welford-style per-tile combine would be more robust if |mean| >> std.
    var = jnp.maximum(sum_x2 / M - mean * mean, 0.0)  # biased var (PyTorch BN)
    inv_std = jax.lax.rsqrt(var + eps)

    g = gamma.astype(jnp.float32)
    b = beta.astype(jnp.float32)
    scale = g * inv_std                   # (H,)
    shift = b - mean * scale              # (H,)
    ss = jnp.stack([jnp.tile(scale, P), jnp.tile(shift, P)], axis=0)  # (2, L)

    # ---- Pass 2: elementwise y = x*scale + shift (affine fused). ----
    y = pl.pallas_call(
        _normalize_kernel,
        out_shape=jax.ShapeDtypeStruct((M_lanes, L), e.dtype),
        grid_spec=pltpu.PrefetchScalarGridSpec(
            num_scalar_prefetch=0,
            grid=(grid_m,),
            in_specs=[
                pl.BlockSpec((tile, L), lambda i: (i, 0)),
                pl.BlockSpec((2, L), lambda i: (0, 0)),
            ],
            out_specs=pl.BlockSpec((tile, L), lambda i: (i, 0)),
        ),
        compiler_params=pltpu.CompilerParams(
            dimension_semantics=("parallel",)),
    )(x, ss)

    return y.reshape(B, N1, N2, C, H)


def _reference(e, gamma, beta, eps=1e-5):
    """Pure-JAX reference matching nn.BatchNorm3d(H, track_running_stats=False)."""
    H = e.shape[-1]
    x = e.reshape(-1, H).astype(jnp.float32)
    mean = x.mean(axis=0)
    var = x.var(axis=0)  # biased
    y = (x - mean) * jax.lax.rsqrt(var + eps) * gamma + beta
    return y.reshape(e.shape).astype(e.dtype)


if __name__ == "__main__":
    # (batch_size, num_nodes, num_nodes, num_commodities, hidden_dim)
    B, N, C, H = 2, 8, 3, 32
    key = jax.random.PRNGKey(0)
    k_e, k_g, k_b = jax.random.split(key, 3)

    e = jax.random.normal(k_e, (B, N, N, C, H), dtype=jnp.float32) * 2.0 + 0.5
    # PyTorch default init is gamma=1, beta=0; use non-trivial deterministic
    # values to exercise the full affine path.
    gamma = 1.0 + 0.1 * jax.random.normal(k_g, (H,), dtype=jnp.float32)
    beta = 0.1 * jax.random.normal(k_b, (H,), dtype=jnp.float32)

    out = batch_norm_edge(e, gamma, beta)
    out = jax.block_until_ready(out)

    ref = _reference(e, gamma, beta)
    assert out.shape == e.shape and out.dtype == e.dtype
    assert jnp.allclose(out, ref, atol=1e-4, rtol=1e-4), (
        float(jnp.max(jnp.abs(out - ref))))

    print("KERNEL_OK")
</pallas_src>

<mosaic_0001>
module attributes {stable_mosaic.version = 11 : i64} {
  func.func @_stats_kernel(%arg0: i32, %arg1: i32, %arg2: memref<96x128xf32, #tpu.memory_space<vmem>>, %arg3: memref<1x16x128xf32, #tpu.memory_space<vmem>>) attributes {dimension_semantics = [#tpu.dimension_semantics<parallel>, #tpu.dimension_semantics<arbitrary>], iteration_bounds = array<i64: 1, 1>, scalar_prefetch = 0 : i64, scratch_operands = 0 : i64, tpu.core_type = #tpu.core_type<tc>, window_params = [{transform_indices = @transform_0, window_bounds = array<i64: 96, 128>}, {transform_indices = @transform_1, window_bounds = array<i64: 1, 16, 128>}]} {
    %c0_i32 = arith.constant 0 : i32
    %0 = arith.cmpi eq, %arg1, %c0_i32 : i32
    %1 = arith.extui %0 : i1 to i32
    %c0_i32_0 = arith.constant 0 : i32
    %2 = arith.cmpi ne, %1, %c0_i32_0 : i32
    scf.if %2 {
      %cst_14 = arith.constant 0.000000e+00 : f32
      %20 = vector.broadcast %cst_14 : f32 to vector<1x16x128xf32>
      %c0_15 = arith.constant 0 : index
      %c0_16 = arith.constant 0 : index
      %c0_17 = arith.constant 0 : index
      %21 = vector.load %arg3[%c0_15, %c0_16, %c0_17] : memref<1x16x128xf32, #tpu.memory_space<vmem>>, vector<1x16x128xf32>
      tpu.vector_store %arg3[%c0_15, %c0_16, %c0_17], %20 {strides = array<i32>} : memref<1x16x128xf32, #tpu.memory_space<vmem>>, vector<1x16x128xf32>,
    } else {
    }
    %c0 = arith.constant 0 : index
    %c0_1 = arith.constant 0 : index
    %3 = vector.load %arg2[%c0, %c0_1] : memref<96x128xf32, #tpu.memory_space<vmem>>, vector<96x128xf32>
    %4 = vector.shape_cast %3 : vector<96x128xf32> to vector<12x8x128xf32>
    %c0_2 = arith.constant 0 : index
    %c0_3 = arith.constant 0 : index
    %c0_4 = arith.constant 0 : index
    %5 = vector.load %arg3[%c0_2, %c0_3, %c0_4] : memref<1x16x128xf32, #tpu.memory_space<vmem>>, vector<1x8x128xf32>
    %6 = vector.shape_cast %5 : vector<1x8x128xf32> to vector<8x128xf32>
    %cst = arith.constant dense<0.000000e+00> : vector<8x128xf32>
    %7 = vector.multi_reduction <add>, %4, %cst [0] : vector<12x8x128xf32> to vector<8x128xf32>
    %8 = arith.addf %6, %7 : vector<8x128xf32>
    %c0_5 = arith.constant 0 : index
    %c0_6 = arith.constant 0 : index
    %c0_7 = arith.constant 0 : index
    %9 = vector.load %arg3[%c0_5, %c0_6, %c0_7] : memref<1x16x128xf32, #tpu.memory_space<vmem>>, vector<1x8x128xf32>
    %10 = vector.shape_cast %9 : vector<1x8x128xf32> to vector<8x128xf32>
    %11 = vector.shape_cast %8 : vector<8x128xf32> to vector<1x8x128xf32>
    tpu.vector_store %arg3[%c0_5, %c0_6, %c0_7], %11 {strides = array<i32>} : memref<1x16x128xf32, #tpu.memory_space<vmem>>, vector<1x8x128xf32>,
    %c0_8 = arith.constant 0 : index
    %c8 = arith.constant 8 : index
    %c0_9 = arith.constant 0 : index
    %12 = vector.load %arg3[%c0_8, %c8, %c0_9] : memref<1x16x128xf32, #tpu.memory_space<vmem>>, vector<1x8x128xf32>
    %13 = vector.shape_cast %12 : vector<1x8x128xf32> to vector<8x128xf32>
    %14 = arith.mulf %4, %4 : vector<12x8x128xf32>
    %cst_10 = arith.constant dense<0.000000e+00> : vector<8x128xf32>
    %15 = vector.multi_reduction <add>, %14, %cst_10 [0] : vector<12x8x128xf32> to vector<8x128xf32>
    %16 = arith.addf %13, %15 : vector<8x128xf32>
    %c0_11 = arith.constant 0 : index
    %c8_12 = arith.constant 8 : index
    %c0_13 = arith.constant 0 : index
    %17 = vector.load %arg3[%c0_11, %c8_12, %c0_13] : memref<1x16x128xf32, #tpu.memory_space<vmem>>, vector<1x8x128xf32>
    %18 = vector.shape_cast %17 : vector<1x8x128xf32> to vector<8x128xf32>
    %19 = vector.shape_cast %16 : vector<8x128xf32> to vector<1x8x128xf32>
    tpu.vector_store %arg3[%c0_11, %c8_12, %c0_13], %19 {strides = array<i32>} : memref<1x16x128xf32, #tpu.memory_space<vmem>>, vector<1x8x128xf32>,
    return
  }
  func.func @transform_0(%arg0: i32, %arg1: i32) -> (i32, i32) {
    %c1_i32 = arith.constant 1 : i32
    %0 = arith.muli %arg0, %c1_i32 : i32
    %1 = arith.addi %0, %arg1 : i32
    %c0_i32 = arith.constant 0 : i32
    %c0_i32_0 = arith.constant 0 : i32
    return %1, %c0_i32 : i32, i32
  }
  func.func @transform_1(%arg0: i32, %arg1: i32) -> (i32, i32, i32) {
    %c0_i32 = arith.constant 0 : i32
    %c0_i32_0 = arith.constant 0 : i32
    %c0_i32_1 = arith.constant 0 : i32
    return %arg0, %c0_i32, %c0_i32_0 : i32, i32, i32
  }
}

module attributes {stable_mosaic.version = 11 : i64} {
  func.func @_normalize_kernel(%arg0: i32, %arg1: memref<96x128xf32, #tpu.memory_space<vmem>>, %arg2: memref<2x128xf32, #tpu.memory_space<vmem>>, %arg3: memref<96x128xf32, #tpu.memory_space<vmem>>) attributes {dimension_semantics = [#tpu.dimension_semantics<parallel>], iteration_bounds = array<i64: 1>, scalar_prefetch = 0 : i64, scratch_operands = 0 : i64, tpu.core_type = #tpu.core_type<tc>, window_params = [{transform_indices = @transform_0, window_bounds = array<i64: 96, 128>}, {pipeline_mode = #tpu.pipeline_mode<synchronous>, transform_indices = @transform_1, window_bounds = array<i64: 2, 128>}, {transform_indices = @transform_2, window_bounds = array<i64: 96, 128>}]} {
    %c0 = arith.constant 0 : index
    %c0_0 = arith.constant 0 : index
    %0 = vector.load %arg1[%c0, %c0_0] : memref<96x128xf32, #tpu.memory_space<vmem>>, vector<96x128xf32>
    %c0_1 = arith.constant 0 : index
    %c0_2 = arith.constant 0 : index
    %1 = vector.load %arg2[%c0_1, %c0_2] : memref<2x128xf32, #tpu.memory_space<vmem>>, vector<1x128xf32>
    %2 = vector.broadcast %1 : vector<1x128xf32> to vector<96x128xf32>
    %3 = arith.mulf %0, %2 : vector<96x128xf32>
    %c1 = arith.constant 1 : index
    %c0_3 = arith.constant 0 : index
    %4 = vector.load %arg2[%c1, %c0_3] : memref<2x128xf32, #tpu.memory_space<vmem>>, vector<1x128xf32>
    %5 = vector.broadcast %4 : vector<1x128xf32> to vector<96x128xf32>
    %6 = arith.addf %3, %5 : vector<96x128xf32>
    %c0_4 = arith.constant 0 : index
    %c0_5 = arith.constant 0 : index
    %7 = vector.load %arg3[%c0_4, %c0_5] : memref<96x128xf32, #tpu.memory_space<vmem>>, vector<96x128xf32>
    tpu.vector_store %arg3[%c0_4, %c0_5], %6 {strides = array<i32>} : memref<96x128xf32, #tpu.memory_space<vmem>>, vector<96x128xf32>,
    return
  }
  func.func @transform_0(%arg0: i32) -> (i32, i32) {
    %c0_i32 = arith.constant 0 : i32
    %c0_i32_0 = arith.constant 0 : i32
    return %arg0, %c0_i32 : i32, i32
  }
  func.func @transform_1(%arg0: i32) -> (i32, i32) {
    %c0_i32 = arith.constant 0 : i32
    %c0_i32_0 = arith.constant 0 : i32
    %c0_i32_1 = arith.constant 0 : i32
    return %c0_i32, %c0_i32_0 : i32, i32
  }
  func.func @transform_2(%arg0: i32) -> (i32, i32) {
    %c0_i32 = arith.constant 0 : i32
    %c0_i32_0 = arith.constant 0 : i32
    return %arg0, %c0_i32 : i32, i32
  }
}

</mosaic_0001>

<bundles_post_ra>
// kernel: tile.17
= control target key start
LH: loop header
LB: loop body
LE: loop exit
PB: predicated region body
PF: predicated region fallthrough
CT: control target
= control target key end

     0   :  { %s22_s0 = inlined_call_operand.vmem [shape: f32[32], index: 0, kind: input, shape index: {}]   ;;  %s23_s1 = inlined_call_operand.vmem [shape: f32[4,32], index: 1, kind: output, shape index: {}]  }
   0x1   :  { %v4_v0 = vld [vmem:[%s22_s0] ss:$0 sm:$0xff] }
   0x2   :  { %5 = vst [vmem:[%s23_s1] sm:$0xf] %v4_v0 }

// kernel: tile.19
= control target key start
LH: loop header
LB: loop body
LE: loop exit
PB: predicated region body
PF: predicated region fallthrough
CT: control target
= control target key end

     0   :  { %s37_s8 = smov 32   ;;  %s38_s9 = smov 64   ;;  %vm7_vm0 = vcmask 261120   ;;  %vm13_vm1 = vcmask 1048320   ;;  %vm19_vm2 = vcmask 785920   ;;  %vm25_vm3 = vcmask 523520   ;;  %s55_s0 = inlined_call_operand.vmem [shape: f32[4,32], index: 0, kind: input, shape index: {}]   ;;  %s56_s1 = inlined_call_operand.vmem [shape: f32[1,128], index: 1, kind: output, shape index: {}]  }
   0x1   :  { %v4_v0 = vld [vmem:[%s55_s0] sm:$0xf]  ;;  %s36_s0 = smov 96  }
   0x2   :  { %5 = vst [vmem:[#allocation1] sm:$0xf] %v4_v0 }
   0x9   :  { %v10_v1 = vld [vmem:[#allocation1 + $0x3] sm:$0x1]   ;;  %v22_v2 = vld [vmem:[#allocation1 + $0x1] sm:$0x1]   ;;  %v16_v3 = vld [vmem:[#allocation1 + $0x2] sm:$0x1]  }
   0xa   :  { %11 = vrot.lane.b32.xlu0 %v10_v1, %s36_s0  ;;  %23 = vrot.lane.b32.xlu1 %v22_v2, %s37_s8  ;;  %v6_v4 = vld [vmem:[#allocation1] sm:$0x1]  }
   0xb   :  { %8 = vst.msk [vmem:[#allocation0] sm:$0x1] %vm7_vm0, %v6_v4  }
  0x12   :  { %17 = vrot.lane.b32.xlu0 %v16_v3, %s38_s9 }
  0x7c   :  { %v12_v5 = vpop.permute.xlu0 %11   ;;  %v24_v6 = vpop.permute.xlu1 %23  }
  0x7d   :  { %14 = vst.msk [vmem:[#allocation0] sm:$0x1] %vm13_vm1, %v12_v5  }
  0x84   :  { %v18_v7 = vpop.permute.xlu0 %17  }
  0x85   :  { %20 = vst.msk [vmem:[#allocation0] sm:$0x1] %vm19_vm2, %v18_v7  }
  0x86   :  { %26 = vst.msk [vmem:[#allocation0] sm:$0x1] %vm25_vm3, %v24_v6  }
  0x8d   :  { %v29_v8 = vld [vmem:[#allocation0] sm:$0x1] }
  0x8e   :  { %32 = vst [vmem:[%s56_s1] sm:$0x1] %v29_v8 }

// kernel: batch_norm_edge.3
= control target key start
LH: loop header
LB: loop body
LE: loop exit
PB: predicated region body
PF: predicated region fallthrough
CT: control target
= control target key end

     0   :  { %s162_s0 = inlined_call_operand.vmem [shape: f32[96,128], index: 0, kind: input, shape index: {}]   ;;  %s163_s1 = inlined_call_operand.vmem [shape: f32[2,128], index: 1, kind: input, shape index: {}]   ;;  %s164_s2 = inlined_call_operand.vmem [shape: f32[96,128], index: 2, kind: output, shape index: {}]  }
   0x1   :  { %v11_v0 = vld [vmem:[%s162_s0] sm:$0xff]  ;;  %v12_v3 = vld [vmem:[%s162_s0 + $0x8] sm:$0xff]  ;;  %v13_v6 = vld [vmem:[%s162_s0 + $0x10] sm:$0xff] }
   0x2   :  { %v67_v1 = vld [vmem:[%s163_s1] ss:$0 sm:$0xff]  ;;  %v68_v2 = vld [vmem:[%s163_s1 + $0x1] ss:$0 sm:$0xff]  ;;  %v14_v7 = vld [vmem:[%s162_s0 + $0x18] sm:$0xff] }
   0x3   :  { %v25_v4 = vmul.f32 %v67_v1, %v11_v0  ;;  %v26_v5 = vmul.f32 %v67_v1, %v12_v3  ;;  %v15_v8 = vld [vmem:[%s162_s0 + $0x20] sm:$0xff]  ;;  %v27_v9 = vmul.f32 %v67_v1, %v13_v6  ;;  %v28_v10 = vmul.f32 %v67_v1, %v14_v7  ;;  %v16_v12 = vld [vmem:[%s162_s0 + $0x28] sm:$0xff]  ;;  %v17_v13 = vld [vmem:[%s162_s0 + $0x30] sm:$0xff] }
   0x4   :  { %v29_v11 = vmul.f32 %v67_v1, %v15_v8  ;;  %v18_v14 = vld [vmem:[%s162_s0 + $0x38] sm:$0xff]  ;;  %v30_v17 = vmul.f32 %v67_v1, %v16_v12  ;;  %v31_v18 = vmul.f32 %v67_v1, %v17_v13  ;;  %v19_v19 = vld [vmem:[%s162_s0 + $0x40] sm:$0xff]  ;;  %v20_v20 = vld [vmem:[%s162_s0 + $0x48] sm:$0xff] }
   0x5   :  { %v39_v15 = vadd.f32 %v68_v2, %v25_v4  ;;  %v40_v16 = vadd.f32 %v68_v2, %v26_v5  ;;  %v41_v21 = vadd.f32 %v68_v2, %v27_v9  ;;  %v42_v22 = vadd.f32 %v68_v2, %v28_v10  ;;  %v21_v24 = vld [vmem:[%s162_s0 + $0x50] sm:$0xff]  ;;  %v22_v27 = vld [vmem:[%s162_s0 + $0x58] sm:$0xff] }
   0x6   :  { %v32_v23 = vmul.f32 %v67_v1, %v18_v14  ;;  %v43_v25 = vadd.f32 %v68_v2, %v29_v11  ;;  %v33_v26 = vmul.f32 %v67_v1, %v19_v19  ;;  %v44_v28 = vadd.f32 %v68_v2, %v30_v17 }
   0x7   :  { %51 = vst [vmem:[%s164_s2] sm:$0xff] %v39_v15  ;;  %v34_v29 = vmul.f32 %v67_v1, %v20_v20  ;;  %v45_v30 = vadd.f32 %v68_v2, %v31_v18  ;;  %v35_v31 = vmul.f32 %v67_v1, %v21_v24  ;;  %v36_v33 = vmul.f32 %v67_v1, %v22_v27 }
   0x8   :  { %52 = vst [vmem:[%s164_s2 + $0x8] sm:$0xff] %v40_v16  ;;  %v46_v32 = vadd.f32 %v68_v2, %v32_v23  ;;  %v47_v34 = vadd.f32 %v68_v2, %v33_v26 }
   0x9   :  { %53 = vst [vmem:[%s164_s2 + $0x10] sm:$0xff] %v41_v21  ;;  %v48_v35 = vadd.f32 %v68_v2, %v34_v29  ;;  %v49_v36 = vadd.f32 %v68_v2, %v35_v31  ;;  %v50_v37 = vadd.f32 %v68_v2, %v36_v33 }
   0xa   :  { %54 = vst [vmem:[%s164_s2 + $0x18] sm:$0xff] %v42_v22 }
   0xb   :  { %55 = vst [vmem:[%s164_s2 + $0x20] sm:$0xff] %v43_v25 }
   0xc   :  { %56 = vst [vmem:[%s164_s2 + $0x28] sm:$0xff] %v44_v28 }
   0xd   :  { %57 = vst [vmem:[%s164_s2 + $0x30] sm:$0xff] %v45_v30 }
   0xe   :  { %58 = vst [vmem:[%s164_s2 + $0x38] sm:$0xff] %v46_v32 }
   0xf   :  { %59 = vst [vmem:[%s164_s2 + $0x40] sm:$0xff] %v47_v34 }
  0x10   :  { %60 = vst [vmem:[%s164_s2 + $0x48] sm:$0xff] %v48_v35 }
  0x11   :  { %61 = vst [vmem:[%s164_s2 + $0x50] sm:$0xff] %v49_v36 }
  0x12   :  { %62 = vst [vmem:[%s164_s2 + $0x58] sm:$0xff] %v50_v37 }

// kernel: batch_norm_edge.2
= control target key start
LH: loop header
LB: loop body
LE: loop exit
PB: predicated region body
PF: predicated region fallthrough
CT: control target
= control target key end

     0   :  { %s151_s0 = inlined_call_operand.vmem [shape: f32[96,128], index: 0, kind: input, shape index: {}]   ;;  %s152_s1 = inlined_call_operand.vmem [shape: f32[1,16,128], index: 1, kind: output, shape index: {}]  }
   0x1   :  { %v36_v0 = vld [vmem:[%s151_s0] sm:$0xff]  ;;  %v37_v1 = vld [vmem:[%s151_s0 + $0x8] sm:$0xff]  ;;  %v38_v2 = vld [vmem:[%s151_s0 + $0x10] sm:$0xff] }
   0x2   :  { %v39_v3 = vld [vmem:[%s151_s0 + $0x18] sm:$0xff]  ;;  %v49_v4 = vadd.f32 %v37_v1, %v36_v0  ;;  %v63_v5 = vmul.f32 %v36_v0, %v36_v0  ;;  %v64_v6 = vmul.f32 %v37_v1, %v37_v1  ;;  %v65_v7 = vmul.f32 %v38_v2, %v38_v2  ;;  %v40_v8 = vld [vmem:[%s151_s0 + $0x20] sm:$0xff]  ;;  %v41_v12 = vld [vmem:[%s151_s0 + $0x28] sm:$0xff] }
   0x3   :  { %v66_v10 = vmul.f32 %v39_v3, %v39_v3  ;;  %v67_v14 = vmul.f32 %v40_v8, %v40_v8  ;;  %v42_v16 = vld [vmem:[%s151_s0 + $0x30] sm:$0xff]  ;;  %v68_v18 = vmul.f32 %v41_v12, %v41_v12  ;;  %v43_v20 = vld [vmem:[%s151_s0 + $0x38] sm:$0xff]  ;;  %v44_v24 = vld [vmem:[%s151_s0 + $0x40] sm:$0xff] }
   0x4   :  { %v50_v9 = vadd.f32 %v49_v4, %v38_v2  ;;  %v75_v11 = vadd.f32 %v64_v6, %v63_v5  ;;  %v69_v22 = vmul.f32 %v42_v16, %v42_v16  ;;  %v70_v26 = vmul.f32 %v43_v20, %v43_v20  ;;  %v45_v28 = vld [vmem:[%s151_s0 + $0x48] sm:$0xff]  ;;  %v46_v32 = vld [vmem:[%s151_s0 + $0x50] sm:$0xff]  ;;  %v47_v36 = vld [vmem:[%s151_s0 + $0x58] sm:$0xff] }
   0x5   :  { %v71_v30 = vmul.f32 %v44_v24, %v44_v24  ;;  %v72_v34 = vmul.f32 %v45_v28, %v45_v28  ;;  %v73_v38 = vmul.f32 %v46_v32, %v46_v32  ;;  %v74_v41 = vmul.f32 %v47_v36, %v47_v36 }
   0x6   :  { %v51_v13 = vadd.f32 %v50_v9, %v39_v3  ;;  %v76_v15 = vadd.f32 %v75_v11, %v65_v7 }
   0x8   :  { %v52_v17 = vadd.f32 %v51_v13, %v40_v8  ;;  %v77_v19 = vadd.f32 %v76_v15, %v66_v10 }
   0xa   :  { %v53_v21 = vadd.f32 %v52_v17, %v41_v12  ;;  %v78_v23 = vadd.f32 %v77_v19, %v67_v14 }
   0xc   :  { %v54_v25 = vadd.f32 %v53_v21, %v42_v16  ;;  %v79_v27 = vadd.f32 %v78_v23, %v68_v18 }
   0xe   :  { %v55_v29 = vadd.f32 %v54_v25, %v43_v20  ;;  %v80_v31 = vadd.f32 %v79_v27, %v69_v22 }
  0x10   :  { %v56_v33 = vadd.f32 %v55_v29, %v44_v24  ;;  %v81_v35 = vadd.f32 %v80_v31, %v70_v26 }
  0x12   :  { %v57_v37 = vadd.f32 %v56_v33, %v45_v28  ;;  %v82_v39 = vadd.f32 %v81_v35, %v71_v30 }
  0x14   :  { %v58_v40 = vadd.f32 %v57_v37, %v46_v32  ;;  %v83_v42 = vadd.f32 %v82_v39, %v72_v34 }
  0x16   :  { %v59_v43 = vadd.f32 %v58_v40, %v47_v36  ;;  %v84_v44 = vadd.f32 %v83_v42, %v73_v38 }
  0x18   :  { %v85_v45 = vadd.f32 %v84_v44, %v74_v41  ;;  %61 = vst [vmem:[%s152_s1] sm:$0xff] %v59_v43 }
  0x1a   :  { %87 = vst [vmem:[%s152_s1 + $0x8] sm:$0xff] %v85_v45 }

</bundles_post_ra>
